<compile_context>
chip_gen: v6e
topology: v6e:2x2x1
jax: 0.10.0
libtpu: 0.0.40
codegen_flags: <defaults>
</compile_context>

<pallas_src>
import jax
import jax.numpy as jnp
from jax.experimental import pallas as pl
from jax.experimental.pallas import tpu as pltpu

LANE = 128
SUBLANE = 8


def _round_up(x, m):
    return ((x + m - 1) // m) * m


def _fe_kernel(x_ref, w1_ref, b1_ref, w2_ref, b2_ref, o_ref):
    # hidden = relu(x @ W1 + b1)   (MXU matmul, f32 accumulation)
    x = x_ref[...].astype(w1_ref.dtype)            # in-kernel cast (f32 no-op, or bf16 for MXU)
    h = jnp.dot(x, w1_ref[...], preferred_element_type=jnp.float32)
    h = jnp.maximum(h + b1_ref[...], 0.0)          # f32 VPU bias-add / ReLU
    # Dropout(0.3) -> identity in eval mode.
    # out = relu(h @ W2 + b2)
    y = jnp.dot(h.astype(w2_ref.dtype), w2_ref[...], preferred_element_type=jnp.float32)
    o_ref[...] = jnp.maximum(y + b2_ref[...], 0.0).astype(o_ref.dtype)


def feature_extractor_forward(x, w1, b1, w2, b2, *, tile_b=4096, compute_dtype=None,
                              vmem_limit_bytes=None):
    """Eval-mode forward of FeatureExtractor.

    x:  [B, input_dim]           (f32 or bf16)
    w1: [input_dim, 128]  b1: [1, 128] (or [128])
    w2: [128, feature_dim] b2: [1, feature_dim] (or [feature_dim])
    compute_dtype: None (use x/weight dtype) or jnp.bfloat16 for MXU operands (all generations);
                   accumulation, bias-add and ReLU stay in f32; output dtype == x.dtype.
    vmem_limit_bytes: optional larger scoped-VMEM budget (v5e/v6e) forwarded to the compiler.
    """
    B, input_dim = x.shape
    hidden = w1.shape[1]
    feature_dim = w2.shape[1]
    out_dtype = x.dtype

    b1 = b1.reshape(1, hidden).astype(jnp.float32)
    b2 = b2.reshape(1, feature_dim).astype(jnp.float32)
    if compute_dtype is not None:
        # Only pre-cast the tiny resident weights; x is cast inside the kernel.
        w1 = w1.astype(compute_dtype)
        w2 = w2.astype(compute_dtype)

    # ---------------- batch-tile selection ----------------
    tile_b = max(SUBLANE, int(tile_b))
    if B <= tile_b:
        if B >= 2 * SUBLANE:
            # Prefer >= 2 grid steps so the "parallel" batch axis can use both TCs on v7x.
            tile_b = _round_up(pl.cdiv(B, 2), SUBLANE)
        else:
            tile_b = B                      # single full-extent block (legal: equals array dim)
    else:
        tile_b = _round_up(tile_b, SUBLANE)

    # Shrink the tile until the per-step footprint (double-buffered x + out, single-buffered
    # weights) fits the VMEM budget.  28 MiB default keeps us under v7x's 32 MiB scoped default.
    act_bytes = jnp.dtype(x.dtype).itemsize
    out_bytes = jnp.dtype(out_dtype).itemsize
    w_bytes = jnp.dtype(w1.dtype).itemsize
    budget = int(vmem_limit_bytes) if vmem_limit_bytes is not None else 28 * 1024 * 1024
    weights_bytes = (input_dim * hidden + hidden * feature_dim) * w_bytes + (hidden + feature_dim) * 4
    while tile_b > SUBLANE:
        footprint = 2 * tile_b * (input_dim * act_bytes + feature_dim * out_bytes) + weights_bytes
        if footprint <= budget:
            break
        tile_b = max(SUBLANE, _round_up(tile_b // 2, SUBLANE))

    grid = (pl.cdiv(B, tile_b),)            # last block may be partial; Pallas masks OOB rows

    cost = pl.CostEstimate(
        flops=2 * B * (input_dim * hidden + hidden * feature_dim),
        transcendentals=0,
        bytes_accessed=(x.size * act_bytes + w1.size * w_bytes + w2.size * w_bytes
                        + b1.size * 4 + b2.size * 4 + B * feature_dim * out_bytes),
    )

    cp_kwargs = dict(dimension_semantics=("parallel",))   # shard batch tiles across TCs (v7x)
    if vmem_limit_bytes is not None:
        cp_kwargs["vmem_limit_bytes"] = int(vmem_limit_bytes)
    compiler_params = pltpu.CompilerParams(**cp_kwargs)

    x_spec = pl.BlockSpec((tile_b, input_dim), lambda i: (i, 0))        # streamed, unpadded K
    out_spec = pl.BlockSpec((tile_b, feature_dim), lambda i: (i, 0))    # exact lane width, no slice

    def run(single_buffer_weights):
        def resident(shape):
            imap = lambda i: (0,) * len(shape)
            if single_buffer_weights:
                return pl.BlockSpec(shape, imap, pipeline_mode=pl.Buffered(1))
            return pl.BlockSpec(shape, imap)

        return pl.pallas_call(
            _fe_kernel,
            out_shape=jax.ShapeDtypeStruct((B, feature_dim), out_dtype),
            grid=grid,
            in_specs=[
                x_spec,                                   # x: streamed per batch tile
                resident((input_dim, hidden)),            # W1: resident
                resident((1, hidden)),                    # b1: resident
                resident((hidden, feature_dim)),          # W2: resident
                resident((1, feature_dim)),               # b2: resident
            ],
            out_specs=out_spec,
            compiler_params=compiler_params,
            cost_estimate=cost,
        )(x, w1, b1, w2, b2)

    try:
        return run(True)
    except Exception:
        # Older jax without pipeline_mode/pl.Buffered: fall back to default double-buffered specs
        # (negligible VMEM difference at these weight sizes).
        return run(False)


def init_params(key, input_dim, feature_dim, hidden=128):
    """Deterministic init mirroring nn.Linear's default U(-1/sqrt(fan_in), 1/sqrt(fan_in))."""
    k1, k2, k3, k4 = jax.random.split(key, 4)
    lim1 = 1.0 / jnp.sqrt(jnp.float32(input_dim))
    lim2 = 1.0 / jnp.sqrt(jnp.float32(hidden))
    w1 = jax.random.uniform(k1, (input_dim, hidden), jnp.float32, -lim1, lim1)
    b1 = jax.random.uniform(k2, (1, hidden), jnp.float32, -lim1, lim1)
    w2 = jax.random.uniform(k3, (hidden, feature_dim), jnp.float32, -lim2, lim2)
    b2 = jax.random.uniform(k4, (1, feature_dim), jnp.float32, -lim2, lim2)
    return w1, b1, w2, b2


def _ref_forward(x, w1, b1, w2, b2):
    return jnp.maximum(jnp.maximum(x @ w1 + b1, 0.0) @ w2 + b2, 0.0)


if __name__ == "__main__":
    input_dim, feature_dim = 32, 64
    key = jax.random.PRNGKey(0)
    kx, kp, kx2 = jax.random.split(key, 3)
    w1, b1, w2, b2 = init_params(kp, input_dim, feature_dim)

    # 1) Small batch, f32, single grid step (block == full array extent).
    x = jax.random.normal(kx, (8, input_dim), jnp.float32)
    out = jax.block_until_ready(feature_extractor_forward(x, w1, b1, w2, b2))
    ref = _ref_forward(x, w1, b1, w2, b2)
    assert out.shape == (8, feature_dim)
    assert jnp.allclose(out, ref, atol=1e-5, rtol=1e-5)

    # 2) Batch not a multiple of the tile -> multi-step pipelined grid with a partial last block.
    x2 = jax.random.normal(kx2, (52, input_dim), jnp.float32)
    out2 = jax.block_until_ready(feature_extractor_forward(x2, w1, b1, w2, b2, tile_b=16))
    ref2 = _ref_forward(x2, w1, b1, w2, b2)
    assert out2.shape == (52, feature_dim)
    assert jnp.allclose(out2, ref2, atol=1e-5, rtol=1e-5)

    # 3) Default auto-tile path (>=2 grid steps chosen automatically) + bf16 MXU operands
    #    (in-kernel cast, f32 accumulation) -> loose tolerance vs the f32 reference.
    out3 = jax.block_until_ready(
        feature_extractor_forward(x2, w1, b1, w2, b2, compute_dtype=jnp.bfloat16))
    assert out3.shape == (52, feature_dim)
    assert bool(jnp.all(jnp.isfinite(out3)))
    assert jnp.allclose(out3, ref2, atol=1e-1, rtol=1e-1)

    print("KERNEL_OK")
</pallas_src>

<mosaic_0001>
module attributes {stable_mosaic.version = 11 : i64} {
  func.func @_fe_kernel(%arg0: i32, %arg1: memref<8x32xf32, #tpu.memory_space<vmem>>, %arg2: memref<32x128xf32, #tpu.memory_space<vmem>>, %arg3: memref<1x128xf32, #tpu.memory_space<vmem>>, %arg4: memref<128x64xf32, #tpu.memory_space<vmem>>, %arg5: memref<1x64xf32, #tpu.memory_space<vmem>>, %arg6: memref<8x64xf32, #tpu.memory_space<vmem>>) attributes {dimension_semantics = [#tpu.dimension_semantics<parallel>], iteration_bounds = array<i64: 1>, scalar_prefetch = 0 : i64, scratch_operands = 0 : i64, tpu.core_type = #tpu.core_type<tc>, window_params = [{transform_indices = @transform_0, window_bounds = array<i64: 8, 32>}, {pipeline_mode = #tpu.pipeline_mode<synchronous>, transform_indices = @transform_1, window_bounds = array<i64: 32, 128>}, {pipeline_mode = #tpu.pipeline_mode<synchronous>, transform_indices = @transform_2, window_bounds = array<i64: 1, 128>}, {pipeline_mode = #tpu.pipeline_mode<synchronous>, transform_indices = @transform_3, window_bounds = array<i64: 128, 64>}, {pipeline_mode = #tpu.pipeline_mode<synchronous>, transform_indices = @transform_4, window_bounds = array<i64: 1, 64>}, {transform_indices = @transform_5, window_bounds = array<i64: 8, 64>}]} {
    %c0 = arith.constant 0 : index
    %c0_0 = arith.constant 0 : index
    %0 = vector.load %arg1[%c0, %c0_0] : memref<8x32xf32, #tpu.memory_space<vmem>>, vector<8x32xf32>
    %c0_1 = arith.constant 0 : index
    %c0_2 = arith.constant 0 : index
    %1 = vector.load %arg2[%c0_1, %c0_2] : memref<32x128xf32, #tpu.memory_space<vmem>>, vector<32x128xf32>
    %cst = arith.constant dense<0.000000e+00> : vector<8x128xf32>
    %2 = tpu.matmul %0, %1, %cst {dimension_numbers = #tpu.dot_dimension_numbers<[1], [0], [0], [1], [0, 0, 1, 1], [], []>} : vector<8x32xf32>, vector<32x128xf32>, vector<8x128xf32> -> vector<8x128xf32>
    %c0_3 = arith.constant 0 : index
    %c0_4 = arith.constant 0 : index
    %3 = vector.load %arg3[%c0_3, %c0_4] : memref<1x128xf32, #tpu.memory_space<vmem>>, vector<1x128xf32>
    %4 = vector.broadcast %3 : vector<1x128xf32> to vector<8x128xf32>
    %5 = arith.addf %2, %4 : vector<8x128xf32>
    %cst_5 = arith.constant 0.000000e+00 : f32
    %6 = vector.broadcast %cst_5 : f32 to vector<8x128xf32>
    %7 = arith.maximumf %5, %6 : vector<8x128xf32>
    %c0_6 = arith.constant 0 : index
    %c0_7 = arith.constant 0 : index
    %8 = vector.load %arg4[%c0_6, %c0_7] : memref<128x64xf32, #tpu.memory_space<vmem>>, vector<128x64xf32>
    %cst_8 = arith.constant dense<0.000000e+00> : vector<8x64xf32>
    %9 = tpu.matmul %7, %8, %cst_8 {dimension_numbers = #tpu.dot_dimension_numbers<[1], [0], [0], [1], [0, 0, 1, 1], [], []>} : vector<8x128xf32>, vector<128x64xf32>, vector<8x64xf32> -> vector<8x64xf32>
    %c0_9 = arith.constant 0 : index
    %c0_10 = arith.constant 0 : index
    %10 = vector.load %arg5[%c0_9, %c0_10] : memref<1x64xf32, #tpu.memory_space<vmem>>, vector<1x64xf32>
    %11 = vector.broadcast %10 : vector<1x64xf32> to vector<8x64xf32>
    %12 = arith.addf %9, %11 : vector<8x64xf32>
    %cst_11 = arith.constant 0.000000e+00 : f32
    %13 = vector.broadcast %cst_11 : f32 to vector<8x64xf32>
    %14 = arith.maximumf %12, %13 : vector<8x64xf32>
    %c0_12 = arith.constant 0 : index
    %c0_13 = arith.constant 0 : index
    %15 = vector.load %arg6[%c0_12, %c0_13] : memref<8x64xf32, #tpu.memory_space<vmem>>, vector<8x64xf32>
    tpu.vector_store %arg6[%c0_12, %c0_13], %14 {strides = array<i32>} : memref<8x64xf32, #tpu.memory_space<vmem>>, vector<8x64xf32>,
    return
  }
  func.func @transform_0(%arg0: i32) -> (i32, i32) {
    %c0_i32 = arith.constant 0 : i32
    %c0_i32_0 = arith.constant 0 : i32
    return %arg0, %c0_i32 : i32, i32
  }
  func.func @transform_1(%arg0: i32) -> (i32, i32) {
    %c0_i32 = arith.constant 0 : i32
    %c0_i32_0 = arith.constant 0 : i32
    %c0_i32_1 = arith.constant 0 : i32
    return %c0_i32, %c0_i32_0 : i32, i32
  }
  func.func @transform_2(%arg0: i32) -> (i32, i32) {
    %c0_i32 = arith.constant 0 : i32
    %c0_i32_0 = arith.constant 0 : i32
    %c0_i32_1 = arith.constant 0 : i32
    return %c0_i32, %c0_i32_0 : i32, i32
  }
  func.func @transform_3(%arg0: i32) -> (i32, i32) {
    %c0_i32 = arith.constant 0 : i32
    %c0_i32_0 = arith.constant 0 : i32
    %c0_i32_1 = arith.constant 0 : i32
    return %c0_i32, %c0_i32_0 : i32, i32
  }
  func.func @transform_4(%arg0: i32) -> (i32, i32) {
    %c0_i32 = arith.constant 0 : i32
    %c0_i32_0 = arith.constant 0 : i32
    %c0_i32_1 = arith.constant 0 : i32
    return %c0_i32, %c0_i32_0 : i32, i32
  }
  func.func @transform_5(%arg0: i32) -> (i32, i32) {
    %c0_i32 = arith.constant 0 : i32
    %c0_i32_0 = arith.constant 0 : i32
    return %arg0, %c0_i32 : i32, i32
  }
}

module attributes {stable_mosaic.version = 11 : i64} {
  func.func @_fe_kernel(%arg0: i32, %arg1: memref<8x32xf32, #tpu.memory_space<vmem>>, %arg2: memref<32x128xf32, #tpu.memory_space<vmem>>, %arg3: memref<1x128xf32, #tpu.memory_space<vmem>>, %arg4: memref<128x64xf32, #tpu.memory_space<vmem>>, %arg5: memref<1x64xf32, #tpu.memory_space<vmem>>, %arg6: memref<8x64xf32, #tpu.memory_space<vmem>>) attributes {dimension_semantics = [#tpu.dimension_semantics<parallel>], iteration_bounds = array<i64: 1>, scalar_prefetch = 0 : i64, scratch_operands = 0 : i64, tpu.core_type = #tpu.core_type<tc>, window_params = [{transform_indices = @transform_0, window_bounds = array<i64: 8, 32>}, {pipeline_mode = #tpu.pipeline_mode<synchronous>, transform_indices = @transform_1, window_bounds = array<i64: 32, 128>}, {pipeline_mode = #tpu.pipeline_mode<synchronous>, transform_indices = @transform_2, window_bounds = array<i64: 1, 128>}, {pipeline_mode = #tpu.pipeline_mode<synchronous>, transform_indices = @transform_3, window_bounds = array<i64: 128, 64>}, {pipeline_mode = #tpu.pipeline_mode<synchronous>, transform_indices = @transform_4, window_bounds = array<i64: 1, 64>}, {transform_indices = @transform_5, window_bounds = array<i64: 8, 64>}]} {
    %c0 = arith.constant 0 : index
    %c0_0 = arith.constant 0 : index
    %0 = vector.load %arg1[%c0, %c0_0] : memref<8x32xf32, #tpu.memory_space<vmem>>, vector<8x32xf32>
    %c0_1 = arith.constant 0 : index
    %c0_2 = arith.constant 0 : index
    %1 = vector.load %arg2[%c0_1, %c0_2] : memref<32x128xf32, #tpu.memory_space<vmem>>, vector<32x128xf32>
    %cst = arith.constant dense<0.000000e+00> : vector<8x128xf32>
    %2 = tpu.matmul %0, %1, %cst {dimension_numbers = #tpu.dot_dimension_numbers<[1], [0], [0], [1], [0, 0, 1, 1], [], []>} : vector<8x32xf32>, vector<32x128xf32>, vector<8x128xf32> -> vector<8x128xf32>
    %c0_3 = arith.constant 0 : index
    %c0_4 = arith.constant 0 : index
    %3 = vector.load %arg3[%c0_3, %c0_4] : memref<1x128xf32, #tpu.memory_space<vmem>>, vector<1x128xf32>
    %4 = vector.broadcast %3 : vector<1x128xf32> to vector<8x128xf32>
    %5 = arith.addf %2, %4 : vector<8x128xf32>
    %cst_5 = arith.constant 0.000000e+00 : f32
    %6 = vector.broadcast %cst_5 : f32 to vector<8x128xf32>
    %7 = arith.maximumf %5, %6 : vector<8x128xf32>
    %c0_6 = arith.constant 0 : index
    %c0_7 = arith.constant 0 : index
    %8 = vector.load %arg4[%c0_6, %c0_7] : memref<128x64xf32, #tpu.memory_space<vmem>>, vector<128x64xf32>
    %cst_8 = arith.constant dense<0.000000e+00> : vector<8x64xf32>
    %9 = tpu.matmul %7, %8, %cst_8 {dimension_numbers = #tpu.dot_dimension_numbers<[1], [0], [0], [1], [0, 0, 1, 1], [], []>} : vector<8x128xf32>, vector<128x64xf32>, vector<8x64xf32> -> vector<8x64xf32>
    %c0_9 = arith.constant 0 : index
    %c0_10 = arith.constant 0 : index
    %10 = vector.load %arg5[%c0_9, %c0_10] : memref<1x64xf32, #tpu.memory_space<vmem>>, vector<1x64xf32>
    %11 = vector.broadcast %10 : vector<1x64xf32> to vector<8x64xf32>
    %12 = arith.addf %9, %11 : vector<8x64xf32>
    %cst_11 = arith.constant 0.000000e+00 : f32
    %13 = vector.broadcast %cst_11 : f32 to vector<8x64xf32>
    %14 = arith.maximumf %12, %13 : vector<8x64xf32>
    %c0_12 = arith.constant 0 : index
    %c0_13 = arith.constant 0 : index
    %15 = vector.load %arg6[%c0_12, %c0_13] : memref<8x64xf32, #tpu.memory_space<vmem>>, vector<8x64xf32>
    tpu.vector_store %arg6[%c0_12, %c0_13], %14 {strides = array<i32>} : memref<8x64xf32, #tpu.memory_space<vmem>>, vector<8x64xf32>,
    return
  }
  func.func @transform_0(%arg0: i32) -> (i32, i32) {
    %c0_i32 = arith.constant 0 : i32
    %c0_i32_0 = arith.constant 0 : i32
    return %arg0, %c0_i32 : i32, i32
  }
  func.func @transform_1(%arg0: i32) -> (i32, i32) {
    %c0_i32 = arith.constant 0 : i32
    %c0_i32_0 = arith.constant 0 : i32
    %c0_i32_1 = arith.constant 0 : i32
    return %c0_i32, %c0_i32_0 : i32, i32
  }
  func.func @transform_2(%arg0: i32) -> (i32, i32) {
    %c0_i32 = arith.constant 0 : i32
    %c0_i32_0 = arith.constant 0 : i32
    %c0_i32_1 = arith.constant 0 : i32
    return %c0_i32, %c0_i32_0 : i32, i32
  }
  func.func @transform_3(%arg0: i32) -> (i32, i32) {
    %c0_i32 = arith.constant 0 : i32
    %c0_i32_0 = arith.constant 0 : i32
    %c0_i32_1 = arith.constant 0 : i32
    return %c0_i32, %c0_i32_0 : i32, i32
  }
  func.func @transform_4(%arg0: i32) -> (i32, i32) {
    %c0_i32 = arith.constant 0 : i32
    %c0_i32_0 = arith.constant 0 : i32
    %c0_i32_1 = arith.constant 0 : i32
    return %c0_i32, %c0_i32_0 : i32, i32
  }
  func.func @transform_5(%arg0: i32) -> (i32, i32) {
    %c0_i32 = arith.constant 0 : i32
    %c0_i32_0 = arith.constant 0 : i32
    return %arg0, %c0_i32 : i32, i32
  }
}

</mosaic_0001>

<bundles_post_ra>
// kernel: tpu_custom_call.1
= control target key start
LH: loop header
LB: loop body
LE: loop exit
PB: predicated region body
PF: predicated region fallthrough
CT: control target
= control target key end

     0   :  { %v314_v1 = vmov 0.0   ;;  %vm315_vm0 = vmmov 0   ;;  %vm33_vm1 = vcmask 261120   ;;  %s443_s0 = inlined_call_operand.vmem [shape: f32[8,32], index: 0, kind: input, shape index: {}]   ;;  %s444_s1 = inlined_call_operand.vmem [shape: f32[32,128], index: 1, kind: input, shape index: {}]   ;;  %s445_s2 = inlined_call_operand.vmem [shape: f32[1,128], index: 2, kind: input, shape index: {}]   ;;  %s446_s3 = inlined_call_operand.vmem [shape: f32[128,64], index: 3, kind: input, shape index: {}]   ;;  %s447_s4 = inlined_call_operand.vmem [shape: f32[1,64], index: 4, kind: input, shape index: {}]   ;;  %s448_s5 = inlined_call_operand.hbm [shape: f32[8,64], index: 5, kind: output, shape index: {}]  }
   0x1   :  { %v25_v0 = vld [vmem:[%s444_s1 + $0x18] sm:$0xff]  ;;  %243 = vmatprep.subr.mxu0 %v314_v1  ;;  %v24_v2 = vld [vmem:[%s444_s1 + $0x10] sm:$0xff]  ;;  %251 = vmatprep.mubr.msk.f32.mxu0 %vm315_vm0, %v314_v1  ;;  %v23_v5 = vld [vmem:[%s444_s1 + $0x8] sm:$0xff] }
   0x2   :  { %v123_v3 = vld [vmem:[%s446_s3 + $0x78] sm:$0xff]  ;;  %244 = vmatpush3.msra.mxu0 %v25_v0  ;;  %254 = vmatprep.subr.mxu1 %v314_v1  ;;  %v122_v4 = vld [vmem:[%s446_s3 + $0x70] sm:$0xff]  ;;  %v121_v6 = vld [vmem:[%s446_s3 + $0x68] sm:$0xff] }
   0x3   :  { %245 = vmatprep.subr.mxu0 %v314_v1  ;;  %255 = vmatpush3.msra.mxu1 %v123_v3  ;;  %v22_v7 = vld [vmem:[%s444_s1] sm:$0xff] }
   0x4   :  { %246 = vmatpush3.msra.mxu0 %v24_v2  ;;  %256 = vmatprep.subr.mxu1 %v314_v1  ;;  %v21_v8 = vld [vmem:[%s443_s0] sm:$0xff] }
   0x5   :  { %247 = vmatprep.subr.mxu0 %v314_v1  ;;  %257 = vmatpush3.msra.mxu1 %v122_v4  ;;  %v120_v9 = vld [vmem:[%s446_s3 + $0x60] sm:$0xff] }
   0x6   :  { %248 = vmatpush3.msra.mxu0 %v23_v5  ;;  %258 = vmatprep.subr.mxu1 %v314_v1 }
   0x7   :  { %10 = vsyncpa [#allocation3], 0  ;;  %249 = vmatprep.subr.mxu0 %v314_v1  ;;  %259 = vmatpush3.msra.mxu1 %v121_v6  ;;  %v119_v10 = vld [vmem:[%s446_s3 + $0x58] sm:$0xff]  ;;  %v118_v11 = vld [vmem:[%s446_s3 + $0x50] sm:$0xff]  ;;  %s316_s11 = smov [#allocation2]   ;;  %vm202_vm2 = vcmask 523264  }
   0x8   :  { %250 = vmatpush3.msra.mxu0 %v22_v7  ;;  %260 = vmatprep.subr.mxu1 %v314_v1  ;;  %v117_v12 = vld [vmem:[%s446_s3 + $0x48] sm:$0xff]  ;;  %v116_v13 = vld [vmem:[%s446_s3 + $0x40] sm:$0xff]  ;;  %v115_v14 = vld [vmem:[%s446_s3 + $0x38] sm:$0xff]  ;;  %s210_s0 = sshll.u32 %s316_s11, 4  ;;  %s211_s0 = int_to_ptr.vmem [resolvable:$true] %s210_s0 }
   0x9   :  { %252 = vmatmul.mubr.msk.f32.vlgmr.msra.gmra.mxu0 %vm33_vm1, %v21_v8  ;;  %261 = vmatpush3.msra.mxu1 %v120_v9  ;;  %v114_v15 = vld [vmem:[%s446_s3 + $0x30] sm:$0xff]  ;;  %v113_v16 = vld [vmem:[%s446_s3 + $0x28] sm:$0xff]  ;;  %v112_v17 = vld [vmem:[%s446_s3 + $0x20] sm:$0xff]  ;;  %p297_p1 = scmp.lt.s32.totalorder %s211_s0, %s211_s0 }
   0xa   :  { %262 = vmatprep.subr.mxu1 %v314_v1  ;;  %286 = vmatprep.mubr.msk.f32.mxu1 %vm315_vm0, %v314_v1  ;;  %v111_v18 = vld [vmem:[%s446_s3 + $0x18] sm:$0xff]  ;;  %v110_v19 = vld [vmem:[%s446_s3 + $0x10] sm:$0xff]  ;;  %v109_v20 = vld [vmem:[%s446_s3 + $0x8] sm:$0xff] }
   0xb   :  { %263 = vmatpush3.msra.mxu1 %v119_v10  ;;  %v108_v21 = vld [vmem:[%s446_s3] sm:$0xff]  ;;  %s292_s3 = scalar_lea.vmem %s211_s0, 128 }
   0xc   :  { %264 = vmatprep.subr.mxu1 %v314_v1  ;;  %v218_v22 = vld [vmem:[%s445_s2] ss:$0 sm:$0xff]  ;;  %p293_p0 = scmp.ne.s32.totalorder %s211_s0, %s292_s3  ;;  %p298_p2 = scmp.lt.s32.totalorder %s292_s3, %s292_s3 }
   0xd   :  { %265 = vmatpush3.msra.mxu1 %v118_v11  ;;  %v220_v27 = vld [vmem:[%s447_s4] ss:$0 sm:$0xff] }
   0xe   :  { %266 = vmatprep.subr.mxu1 %v314_v1  ;;  %p299_p3 = por %p298_p2, %p297_p1 }
   0xf   :  { %267 = vmatpush3.msra.mxu1 %v117_v12 }
  0x10   :  { %268 = vmatprep.subr.mxu1 %v314_v1  ;;  %p300_p4 = pnand %p299_p3, %p293_p0 }
  0x11   :  { %269 = vmatpush3.msra.mxu1 %v116_v13 }
  0x12   :  { %270 = vmatprep.subr.mxu1 %v314_v1 }
  0x13   :  { %271 = vmatpush3.msra.mxu1 %v115_v14 }
  0x14   :  { %272 = vmatprep.subr.mxu1 %v314_v1 }
  0x15   :  { %273 = vmatpush3.msra.mxu1 %v114_v15 }
  0x16   :  { %274 = vmatprep.subr.mxu1 %v314_v1 }
  0x17   :  { %275 = vmatpush3.msra.mxu1 %v113_v16 }
  0x18   :  { %276 = vmatprep.subr.mxu1 %v314_v1 }
  0x19   :  { %277 = vmatpush3.msra.mxu1 %v112_v17 }
  0x1a   :  { %278 = vmatprep.subr.mxu1 %v314_v1 }
  0x1b   :  { %279 = vmatpush3.msra.mxu1 %v111_v18 }
  0x1c   :  { %280 = vmatprep.subr.mxu1 %v314_v1 }
  0x1d   :  { %281 = vmatpush3.msra.mxu1 %v110_v19 }
  0x1e   :  { %282 = vmatprep.subr.mxu1 %v314_v1 }
  0x1f   :  { %283 = vmatpush3.msra.mxu1 %v109_v20 }
  0x20   :  { %284 = vmatprep.subr.mxu1 %v314_v1 }
  0x21   :  { %285 = vmatpush3.msra.mxu1 %v108_v21 }
  0xc9   :  { %v103_v23 = vpop.f32.mrf.mxu0 }
  0xca   :  { %v104_v24 = vadd.f32 %v218_v22, %v103_v23 }
  0xcb   :  { %v253_v25 = vpop.f32.mrf.mxu0 }
  0xcc   :  { %v107_v26 = vmax.f32 %v104_v24, 0.0 }
  0xce   :  { %287 = vmatmul.mubr.f32.vlgmr.msra.gmra.mxu1 %v107_v26 }
 0x18e   :  { %v197_v28 = vpop.f32.mrf.mxu1 }
 0x18f   :  { %v198_v29 = vadd.f32 %v220_v27, %v197_v28 }
 0x190   :  { %v288_v30 = vpop.f32.mrf.mxu1 }
 0x191   :  { %v201_v31 = vmax.f32 %v198_v29, 0.0 }
 0x193   :  { %203 = vst.msk [vmem:[#allocation2] sm:$0xff] %vm202_vm2, %v201_v31 }
 0x194   :  { %303 = shalt.err (!%p300_p4)
}
 0x195   :  { %213 = dma.vmem_to_hbm [thread:$0]  %s211_s0, 128, %s448_s5, [#allocation3]  }
 0x196   :  { %312 = dma.done.wait [#allocation3], 128  }
 0x197   :  { %313 = vsyncadd [#allocation3], 4294967168 }
 0x198   :  { %217 = vsyncpa [#allocation3], 1 }

// kernel: tpu_custom_call.1
= control target key start
LH: loop header
LB: loop body
LE: loop exit
PB: predicated region body
PF: predicated region fallthrough
CT: control target
= control target key end

     0   :  { %v314_v1 = vmov 0.0   ;;  %vm315_vm0 = vmmov 0   ;;  %vm33_vm1 = vcmask 261120   ;;  %s443_s0 = inlined_call_operand.vmem [shape: f32[8,32], index: 0, kind: input, shape index: {}]   ;;  %s444_s1 = inlined_call_operand.vmem [shape: f32[32,128], index: 1, kind: input, shape index: {}]   ;;  %s445_s2 = inlined_call_operand.vmem [shape: f32[1,128], index: 2, kind: input, shape index: {}]   ;;  %s446_s3 = inlined_call_operand.vmem [shape: f32[128,64], index: 3, kind: input, shape index: {}]   ;;  %s447_s4 = inlined_call_operand.vmem [shape: f32[1,64], index: 4, kind: input, shape index: {}]   ;;  %s448_s5 = inlined_call_operand.hbm [shape: f32[8,64], index: 5, kind: output, shape index: {}]  }
   0x1   :  { %v25_v0 = vld [vmem:[%s444_s1 + $0x18] sm:$0xff]  ;;  %243 = vmatprep.subr.mxu0 %v314_v1  ;;  %v24_v2 = vld [vmem:[%s444_s1 + $0x10] sm:$0xff]  ;;  %251 = vmatprep.mubr.msk.f32.mxu0 %vm315_vm0, %v314_v1  ;;  %v23_v5 = vld [vmem:[%s444_s1 + $0x8] sm:$0xff] }
   0x2   :  { %v123_v3 = vld [vmem:[%s446_s3 + $0x78] sm:$0xff]  ;;  %244 = vmatpush3.msra.mxu0 %v25_v0  ;;  %254 = vmatprep.subr.mxu1 %v314_v1  ;;  %v122_v4 = vld [vmem:[%s446_s3 + $0x70] sm:$0xff]  ;;  %v121_v6 = vld [vmem:[%s446_s3 + $0x68] sm:$0xff] }
   0x3   :  { %245 = vmatprep.subr.mxu0 %v314_v1  ;;  %255 = vmatpush3.msra.mxu1 %v123_v3  ;;  %v22_v7 = vld [vmem:[%s444_s1] sm:$0xff] }
   0x4   :  { %246 = vmatpush3.msra.mxu0 %v24_v2  ;;  %256 = vmatprep.subr.mxu1 %v314_v1  ;;  %v21_v8 = vld [vmem:[%s443_s0] sm:$0xff] }
   0x5   :  { %247 = vmatprep.subr.mxu0 %v314_v1  ;;  %257 = vmatpush3.msra.mxu1 %v122_v4  ;;  %v120_v9 = vld [vmem:[%s446_s3 + $0x60] sm:$0xff] }
   0x6   :  { %248 = vmatpush3.msra.mxu0 %v23_v5  ;;  %258 = vmatprep.subr.mxu1 %v314_v1 }
   0x7   :  { %10 = vsyncpa [#allocation3], 0  ;;  %249 = vmatprep.subr.mxu0 %v314_v1  ;;  %259 = vmatpush3.msra.mxu1 %v121_v6  ;;  %v119_v10 = vld [vmem:[%s446_s3 + $0x58] sm:$0xff]  ;;  %v118_v11 = vld [vmem:[%s446_s3 + $0x50] sm:$0xff]  ;;  %s316_s11 = smov [#allocation2]   ;;  %vm202_vm2 = vcmask 523264  }
   0x8   :  { %250 = vmatpush3.msra.mxu0 %v22_v7  ;;  %260 = vmatprep.subr.mxu1 %v314_v1  ;;  %v117_v12 = vld [vmem:[%s446_s3 + $0x48] sm:$0xff]  ;;  %v116_v13 = vld [vmem:[%s446_s3 + $0x40] sm:$0xff]  ;;  %v115_v14 = vld [vmem:[%s446_s3 + $0x38] sm:$0xff]  ;;  %s210_s0 = sshll.u32 %s316_s11, 4  ;;  %s211_s0 = int_to_ptr.vmem [resolvable:$true] %s210_s0 }
   0x9   :  { %252 = vmatmul.mubr.msk.f32.vlgmr.msra.gmra.mxu0 %vm33_vm1, %v21_v8  ;;  %261 = vmatpush3.msra.mxu1 %v120_v9  ;;  %v114_v15 = vld [vmem:[%s446_s3 + $0x30] sm:$0xff]  ;;  %v113_v16 = vld [vmem:[%s446_s3 + $0x28] sm:$0xff]  ;;  %v112_v17 = vld [vmem:[%s446_s3 + $0x20] sm:$0xff]  ;;  %p297_p1 = scmp.lt.s32.totalorder %s211_s0, %s211_s0 }
   0xa   :  { %262 = vmatprep.subr.mxu1 %v314_v1  ;;  %286 = vmatprep.mubr.msk.f32.mxu1 %vm315_vm0, %v314_v1  ;;  %v111_v18 = vld [vmem:[%s446_s3 + $0x18] sm:$0xff]  ;;  %v110_v19 = vld [vmem:[%s446_s3 + $0x10] sm:$0xff]  ;;  %v109_v20 = vld [vmem:[%s446_s3 + $0x8] sm:$0xff] }
   0xb   :  { %263 = vmatpush3.msra.mxu1 %v119_v10  ;;  %v108_v21 = vld [vmem:[%s446_s3] sm:$0xff]  ;;  %s292_s3 = scalar_lea.vmem %s211_s0, 128 }
   0xc   :  { %264 = vmatprep.subr.mxu1 %v314_v1  ;;  %v218_v22 = vld [vmem:[%s445_s2] ss:$0 sm:$0xff]  ;;  %p293_p0 = scmp.ne.s32.totalorder %s211_s0, %s292_s3  ;;  %p298_p2 = scmp.lt.s32.totalorder %s292_s3, %s292_s3 }
   0xd   :  { %265 = vmatpush3.msra.mxu1 %v118_v11  ;;  %v220_v27 = vld [vmem:[%s447_s4] ss:$0 sm:$0xff] }
   0xe   :  { %266 = vmatprep.subr.mxu1 %v314_v1  ;;  %p299_p3 = por %p298_p2, %p297_p1 }
   0xf   :  { %267 = vmatpush3.msra.mxu1 %v117_v12 }
  0x10   :  { %268 = vmatprep.subr.mxu1 %v314_v1  ;;  %p300_p4 = pnand %p299_p3, %p293_p0 }
  0x11   :  { %269 = vmatpush3.msra.mxu1 %v116_v13 }
  0x12   :  { %270 = vmatprep.subr.mxu1 %v314_v1 }
  0x13   :  { %271 = vmatpush3.msra.mxu1 %v115_v14 }
  0x14   :  { %272 = vmatprep.subr.mxu1 %v314_v1 }
  0x15   :  { %273 = vmatpush3.msra.mxu1 %v114_v15 }
  0x16   :  { %274 = vmatprep.subr.mxu1 %v314_v1 }
  0x17   :  { %275 = vmatpush3.msra.mxu1 %v113_v16 }
  0x18   :  { %276 = vmatprep.subr.mxu1 %v314_v1 }
  0x19   :  { %277 = vmatpush3.msra.mxu1 %v112_v17 }
  0x1a   :  { %278 = vmatprep.subr.mxu1 %v314_v1 }
  0x1b   :  { %279 = vmatpush3.msra.mxu1 %v111_v18 }
  0x1c   :  { %280 = vmatprep.subr.mxu1 %v314_v1 }
  0x1d   :  { %281 = vmatpush3.msra.mxu1 %v110_v19 }
  0x1e   :  { %282 = vmatprep.subr.mxu1 %v314_v1 }
  0x1f   :  { %283 = vmatpush3.msra.mxu1 %v109_v20 }
  0x20   :  { %284 = vmatprep.subr.mxu1 %v314_v1 }
  0x21   :  { %285 = vmatpush3.msra.mxu1 %v108_v21 }
  0xc9   :  { %v103_v23 = vpop.f32.mrf.mxu0 }
  0xca   :  { %v104_v24 = vadd.f32 %v218_v22, %v103_v23 }
  0xcb   :  { %v253_v25 = vpop.f32.mrf.mxu0 }
  0xcc   :  { %v107_v26 = vmax.f32 %v104_v24, 0.0 }
  0xce   :  { %287 = vmatmul.mubr.f32.vlgmr.msra.gmra.mxu1 %v107_v26 }
 0x18e   :  { %v197_v28 = vpop.f32.mrf.mxu1 }
 0x18f   :  { %v198_v29 = vadd.f32 %v220_v27, %v197_v28 }
 0x190   :  { %v288_v30 = vpop.f32.mrf.mxu1 }
 0x191   :  { %v201_v31 = vmax.f32 %v198_v29, 0.0 }
 0x193   :  { %203 = vst.msk [vmem:[#allocation2] sm:$0xff] %vm202_vm2, %v201_v31 }
 0x194   :  { %303 = shalt.err (!%p300_p4)
}
 0x195   :  { %213 = dma.vmem_to_hbm [thread:$0]  %s211_s0, 128, %s448_s5, [#allocation3]  }
 0x196   :  { %312 = dma.done.wait [#allocation3], 128  }
 0x197   :  { %313 = vsyncadd [#allocation3], 4294967168 }
 0x198   :  { %217 = vsyncpa [#allocation3], 1 }

</bundles_post_ra>
